<compile_context>
chip_gen: v7x
topology: tpu7x:2x2x1
jax: 0.10.0
libtpu: 0.0.40
codegen_flags: <defaults>
</compile_context>

<pallas_src>
import jax
import jax.numpy as jnp
from jax.experimental import pallas as pl
from jax.experimental.pallas import tpu as pltpu

# Channel plan of the 7 conv layers (cin, cout).
_LAYERS = [(3, 2), (2, 2), (2, 2), (2, 2), (2, 2), (2, 2), (2, 1)]


def _round_up(a, m):
    return ((a + m - 1) // m) * m


def _fold_params(params):
    """Fold the chain of affine 1x1 convs into one (1,3) weight and (1,) bias."""
    w_eff, b_eff = params[0]
    for (w, b) in params[1:]:
        w_eff = w @ w_eff          # (cout, 3)
        b_eff = w @ b_eff + b      # (cout,)
    # -> (4,) vector [w0, w1, w2, bias]
    return jnp.concatenate([w_eff.reshape(-1), b_eff.reshape(-1)]).astype(jnp.float32)


def _affine_kernel(wb_ref, x_ref, o_ref):
    # wb_ref: SMEM (4,)  [w0, w1, w2, b]   (resident scalar operand)
    # x_ref : VMEM (nb, 3, rt, 128)  or  (nb, 3, lt)
    # o_ref : VMEM (nb, rt, 128)     or  (nb, lt)
    w0 = wb_ref[0]
    w1 = wb_ref[1]
    w2 = wb_ref[2]
    b = wb_ref[3]
    y = w0 * x_ref[:, 0] + w1 * x_ref[:, 1] + w2 * x_ref[:, 2] + b
    o_ref[...] = y.astype(o_ref.dtype)


def _fallback_affine(x_nchw, wb, out_dtype):
    # Single fused XLA elementwise pass of the same folded affine map.
    w = wb[:3].reshape(1, 3, 1, 1)
    return (jnp.sum(x_nchw * w, axis=1, keepdims=True) + wb[3]).astype(out_dtype)


def my_model_forward(x_nchw, params, *, max_row_tile=1024,
                     out_dtype=jnp.float32, xla_fallback_below_bytes=0):
    """x_nchw: (N, 3, H, W) float32.  params: list of (w (cout,cin), b (cout,))."""
    N, C, H, W = x_nchw.shape
    assert C == _LAYERS[0][0]
    S = H * W
    max_row_tile = max(8, (max_row_tile // 8) * 8)

    wb = _fold_params(params)                      # (4,) folded weights + bias
    total_bytes = 4 * (C + 1) * N * S              # read 3 planes + write 1 plane

    # Optional escape hatch for KB-scale inputs where launch + pipeline
    # overhead exceeds the whole HBM traffic.  Off by default so the Pallas
    # kernel is always exercised.
    if total_bytes < xla_fallback_below_bytes:
        return _fallback_affine(x_nchw, wb, out_dtype)

    x3 = x_nchw.reshape(N, C, S)                   # free, contiguous reshape

    if S % 128 == 0:
        # ---- main path: sublane+lane dense (N, C, R, 128) -------------------
        R = S // 128
        x_in = x3.reshape(N, C, R, 128)
        if R <= max_row_tile:
            # Whole image fits one row tile: batch images per block so each
            # grid step moves up to ~max_row_tile*128 pixels, while keeping
            # >= 2 grid steps when N >= 2 so a v7x megacore can split the work.
            nb = min(N, max(1, max_row_tile // R))
            if N >= 2:
                nb = min(nb, max(1, N // 2))
            while N % nb:                          # nb | N -> no ragged batch blocks
                nb -= 1
            rt = R
            if N == 1 and R >= 16:                 # v7x: give the 2nd core work
                rt = min(R, _round_up(pl.cdiv(R, 2), 8))
        else:
            # Large image: bounded row tile (multiple of 8) keeps the double-
            # buffered VMEM footprint ~4 MiB on every generation; the last row
            # block may be ragged (Pallas masks the write-back).
            nb, rt = 1, max_row_tile
        grid = (N // nb, pl.cdiv(R, rt))
        in_specs = [
            pl.BlockSpec(memory_space=pltpu.MemorySpace.SMEM),       # folded weights
            pl.BlockSpec((nb, C, rt, 128), lambda n, r: (n, 0, r, 0)),
        ]
        out_spec = pl.BlockSpec((nb, rt, 128), lambda n, r: (n, r, 0))
        out_shape = jax.ShapeDtypeStruct((N, R, 128), out_dtype)
    else:
        # ---- ragged H*W: tile the flat (N, C, S) layout directly -------------
        # No wrapper-side pad / slice (each would cost an extra full HBM pass);
        # the last lane block is ragged and its out-of-bounds part is dropped
        # on the store.
        if N * C * 128 * 4 > (6 << 20):
            # Huge batch with ragged spatial size: even lt=128 blocks would not
            # fit the default scoped VMEM -> one fused XLA pass instead.
            return _fallback_affine(x_nchw, wb, out_dtype)
        x_in = x3
        if S < 128:
            lt = S                                  # full (ragged) lane dim
        else:
            lt = max(128, ((2 << 20) // (N * C * 4)) // 128 * 128)   # ~2 MiB blocks
            lt = min(lt, _round_up(S, 128))
            if S > 256 and pl.cdiv(S, lt) < 2:      # >= 2 steps for v7x megacore
                lt = _round_up(pl.cdiv(S, 2), 128)
        grid = (1, pl.cdiv(S, lt))
        in_specs = [
            pl.BlockSpec(memory_space=pltpu.MemorySpace.SMEM),
            pl.BlockSpec((N, C, lt), lambda n, s: (n, 0, s)),
        ]
        out_spec = pl.BlockSpec((N, lt), lambda n, s: (n, s))
        out_shape = jax.ShapeDtypeStruct((N, S), out_dtype)

    out = pl.pallas_call(
        _affine_kernel,
        out_shape=out_shape,
        grid_spec=pltpu.PrefetchScalarGridSpec(
            num_scalar_prefetch=0,
            grid=grid,
            in_specs=in_specs,
            out_specs=out_spec,
        ),
        compiler_params=pltpu.CompilerParams(
            dimension_semantics=("parallel", "parallel")),
        cost_estimate=pl.CostEstimate(
            flops=6 * N * S, transcendentals=0, bytes_accessed=total_bytes),
    )(wb, x_in)

    return out.reshape(N, 1, H, W)                 # free, contiguous reshape


def _init_params(key):
    params = []
    for (cin, cout) in _LAYERS:
        key, kw, kb = jax.random.split(key, 3)
        bound = 1.0 / (cin ** 0.5)                 # PyTorch-like uniform fan-in init
        w = jax.random.uniform(kw, (cout, cin), jnp.float32, -bound, bound)
        b = jax.random.uniform(kb, (cout,), jnp.float32, -bound, bound)
        params.append((w, b))
    return params


def _reference(x_nchw, params):
    # Pure-JAX reference of the same chain of 1x1 convs (NCHW), layer by layer.
    y = x_nchw
    for (w, b) in params:
        y = jnp.einsum("nchw,oc->nohw", y, w) + b[None, :, None, None]
    return y


if __name__ == "__main__":
    key = jax.random.PRNGKey(0)
    kx, kp = jax.random.split(key)
    x = jax.random.normal(kx, (2, 3, 16, 16), jnp.float32)   # N=2, C=3, H=W=16
    params = _init_params(kp)

    y = my_model_forward(x, params)
    y = jax.block_until_ready(y)

    y_ref = _reference(x, params)
    assert y.shape == (2, 1, 16, 16), y.shape
    max_err = float(jnp.max(jnp.abs(y - y_ref)))
    assert jnp.allclose(y, y_ref, atol=1e-5, rtol=1e-5), max_err

    print("KERNEL_OK")
</pallas_src>

<mosaic_0001>
module attributes {stable_mosaic.version = 11 : i64} {
  func.func @_affine_kernel(%arg0: i32, %arg1: i32, %arg2: memref<4xf32, #tpu.memory_space<smem>>, %arg3: memref<1x3x2x128xf32, #tpu.memory_space<vmem>>, %arg4: memref<1x2x128xf32, #tpu.memory_space<vmem>>) attributes {dimension_semantics = [#tpu.dimension_semantics<parallel>, #tpu.dimension_semantics<parallel>], iteration_bounds = array<i64: 2, 1>, scalar_prefetch = 0 : i64, scratch_operands = 0 : i64, tpu.core_type = #tpu.core_type<tc>, window_params = [{transform_indices = @transform_0, window_bounds = array<i64: 4>}, {transform_indices = @transform_1, window_bounds = array<i64: 1, 3, 2, 128>}, {transform_indices = @transform_2, window_bounds = array<i64: 1, 2, 128>}]} {
    %c0 = arith.constant 0 : index
    %0 = memref.load %arg2[%c0] : memref<4xf32, #tpu.memory_space<smem>>
    %c1 = arith.constant 1 : index
    %1 = memref.load %arg2[%c1] : memref<4xf32, #tpu.memory_space<smem>>
    %c2 = arith.constant 2 : index
    %2 = memref.load %arg2[%c2] : memref<4xf32, #tpu.memory_space<smem>>
    %c3 = arith.constant 3 : index
    %3 = memref.load %arg2[%c3] : memref<4xf32, #tpu.memory_space<smem>>
    %c0_0 = arith.constant 0 : index
    %c0_1 = arith.constant 0 : index
    %c0_2 = arith.constant 0 : index
    %c0_3 = arith.constant 0 : index
    %4 = vector.load %arg3[%c0_0, %c0_1, %c0_2, %c0_3] : memref<1x3x2x128xf32, #tpu.memory_space<vmem>>, vector<1x1x2x128xf32>
    %5 = vector.shape_cast %4 : vector<1x1x2x128xf32> to vector<1x2x128xf32>
    %6 = vector.broadcast %0 : f32 to vector<1x2x128xf32>
    %7 = arith.mulf %6, %5 : vector<1x2x128xf32>
    %c0_4 = arith.constant 0 : index
    %c1_5 = arith.constant 1 : index
    %c0_6 = arith.constant 0 : index
    %c0_7 = arith.constant 0 : index
    %8 = vector.load %arg3[%c0_4, %c1_5, %c0_6, %c0_7] : memref<1x3x2x128xf32, #tpu.memory_space<vmem>>, vector<1x1x2x128xf32>
    %9 = vector.shape_cast %8 : vector<1x1x2x128xf32> to vector<1x2x128xf32>
    %10 = vector.broadcast %1 : f32 to vector<1x2x128xf32>
    %11 = arith.mulf %10, %9 : vector<1x2x128xf32>
    %12 = arith.addf %7, %11 : vector<1x2x128xf32>
    %c0_8 = arith.constant 0 : index
    %c2_9 = arith.constant 2 : index
    %c0_10 = arith.constant 0 : index
    %c0_11 = arith.constant 0 : index
    %13 = vector.load %arg3[%c0_8, %c2_9, %c0_10, %c0_11] : memref<1x3x2x128xf32, #tpu.memory_space<vmem>>, vector<1x1x2x128xf32>
    %14 = vector.shape_cast %13 : vector<1x1x2x128xf32> to vector<1x2x128xf32>
    %15 = vector.broadcast %2 : f32 to vector<1x2x128xf32>
    %16 = arith.mulf %15, %14 : vector<1x2x128xf32>
    %17 = arith.addf %12, %16 : vector<1x2x128xf32>
    %18 = vector.broadcast %3 : f32 to vector<1x2x128xf32>
    %19 = arith.addf %17, %18 : vector<1x2x128xf32>
    %c0_12 = arith.constant 0 : index
    %c0_13 = arith.constant 0 : index
    %c0_14 = arith.constant 0 : index
    %20 = vector.load %arg4[%c0_12, %c0_13, %c0_14] : memref<1x2x128xf32, #tpu.memory_space<vmem>>, vector<1x2x128xf32>
    tpu.vector_store %arg4[%c0_12, %c0_13, %c0_14], %19 {strides = array<i32>} : memref<1x2x128xf32, #tpu.memory_space<vmem>>, vector<1x2x128xf32>,
    return
  }
  func.func @transform_0(%arg0: i32, %arg1: i32) -> i32 {
    %c0_i32 = arith.constant 0 : i32
    %c0_i32_0 = arith.constant 0 : i32
    return %c0_i32 : i32
  }
  func.func @transform_1(%arg0: i32, %arg1: i32) -> (i32, i32, i32, i32) {
    %c0_i32 = arith.constant 0 : i32
    %c0_i32_0 = arith.constant 0 : i32
    %c0_i32_1 = arith.constant 0 : i32
    return %arg0, %c0_i32, %arg1, %c0_i32_0 : i32, i32, i32, i32
  }
  func.func @transform_2(%arg0: i32, %arg1: i32) -> (i32, i32, i32) {
    %c0_i32 = arith.constant 0 : i32
    %c0_i32_0 = arith.constant 0 : i32
    return %arg0, %arg1, %c0_i32 : i32, i32, i32
  }
}

</mosaic_0001>

<bundles_post_ra>
// kernel: tpu_custom_call.1
= control target key start
LH: loop header
LB: loop body
LE: loop exit
PB: predicated region body
PF: predicated region fallthrough
CT: control target
= control target key end

     0   :  { %7 = vsyncpa [#allocation5], 0  ;;  %s766_s0 = inlined_call_operand.hbm [shape: f32[4], index: 0, kind: input, shape index: {}]   ;;  %s767_s1 = inlined_call_operand.hbm [shape: f32[2,3,2,128], index: 1, kind: input, shape index: {}]   ;;  %s768_s2 = inlined_call_operand.hbm [shape: f32[2,2,128], index: 2, kind: output, shape index: {}]  }
   0x1   :  { %8 = vsyncpa [#allocation3], 0 }
   0x2   :  { %10 = vsyncpa [#allocation3 + $0x1], 0 }
   0x3   :  { %11 = vsyncpa [#allocation4], 0 }
   0x4   :  { %13 = vsyncpa [#allocation4 + $0x1], 0  ;;  %s566_s9 = smov 0   ;;  %s568_s10 = smov 0  }
   0x5   :  { %s570_s11 = smov 0   ;;  %s572_s12 = smov 0  }
   0x6   :  { %s574_s13 = smov 0   ;;  %s576_s14 = smov 0  }
   0x7 LB: > { %s319_s15 = sadd.s32 4294967295, %s544_s14   ;;  %s320_s16 = sadd.s32 4294967294, %s544_s14   ;;  %s544_s14 = sphi %s576_s14, %s19_s14   ;;  %s540_s13 = sphi %s574_s13, %s788_s13   ;;  %s536_s12 = sphi %s572_s12, %s787_s12   ;;  %s532_s11 = sphi %s570_s11, %s786_s11   ;;  %s528_s10 = sphi %s568_s10, %s785_s10   ;;  %s524_s9 = sphi %s566_s9, %s784_s9  }
   0x8   : > { %s61_s17 = sadd.s32 1, %s532_s11  ;;  %p68_p0 = scmp.ne.s32.totalorder %s532_s11, %s528_s10 }
   0x9   : > { %p69_p1 = scmp.eq.s32.totalorder %s544_s14, 0  ;;  %p74_p2 = scmp.ne.s32.totalorder %s528_s10, %s524_s9 }
   0xa   : > { %p604_p3 = scmp.eq.s32.totalorder %s319_s15, 0  ;;  %p100_p4 = scmp.eq.s32.totalorder %s319_s15, 1 }
   0xb   : > { %p70_p5 = por %p69_p1, %p68_p0  ;;  %p106_p6 = scmp.eq.s32.totalorder %s320_s16, 1 }
   0xc   : > { %s773_s18 = scalar_select %p604_p3, 1, 0 }
   0xd   : > { %p610_p7 = por %p604_p3, %p74_p2  ;;  %p614_p8 = por %p100_p4, %p68_p0 }
   0xe   : > { %p618_p9 = por %p106_p6, %p74_p2  ;;  %p321_p10 = scmp.ge.s32.totalorder %s544_s14, 1 }
   0xf   : > { %s774_s19 = scalar_select %p610_p7, 1, 0 }
  0x10   : > { %s775_s20 = scalar_select %p614_p8, 1, 0 }
  0x11   : > { %s776_s21 = scalar_select %p618_p9, 1, 0 }
  0x12   : > { %p113_p11 = scmp.lt.s32.totalorder %s544_s14, 3  ;;  %p361_p1 = scmp.lt.s32.totalorder %s544_s14, 2 }
  0x13   : > { %s135_s23 = sand.u32 1, %s532_s11   ;;  %s31_s25 = sadd.s32 1, %s540_s13 }
  0x14   : > { %p625_p13 = pnand %p321_p10, %p113_p11  ;;  %p633_p0 = pnand %p361_p1, %p70_p5 }
  0x15   : > { %s337_s26 = smul.u32 6, %s135_s23  ;;  %p33_p4 = scmp.ge.s32.totalorder %s31_s25, 2 }
  0x16   : > { %p348_p7 = pneg %p625_p13  ;;  %s415_s29 = scalar_lea.hbm %s766_s0, 16 }
  0x17   : > { %p416_p6 = scmp.ne.s32.totalorder %s766_s0, %s415_s29  ;;  %p422_p5 = scmp.lt.u32.totalorder %s415_s29, %s766_s0 }
  0x18   : > { %p349_p2 = pnand %p348_p7, %p604_p3 }
  0x1a   : > { %p417_p10 = pneg %p349_p2 }
  0x1c   : > { %p418_p11 = pnand %p417_p10, %p416_p6 }
  0x1e   : > { %p419_p12 = pneg %p418_p11 }
  0x20   : > { %p424_p1 = pnand %p422_p5, %p419_p12 }
  0x22   : > { %427 = shalt.err (!%p424_p1)
}
  0x23   : > { %s546_s6 = smov [#allocation2]   ;;  %s790_s25 = smov (%p33_p4, %s31_s25), 0 }
  0x24   : > { %351 = dma.hbm_to_smem (!%p349_p2), %s766_s0, 16, %s546_s6, [#allocation5]  }
  0x25   : > { %s338_s15 = smul.u32 96, %s540_s13  ;;  %s56_s16 = ssub.s32 %s540_s13, %s790_s25 }
  0x26   : > { %s139_s27 = scalar_lea.vmem [#allocation6], %s337_s26  ;;  %p59_p7 = scmp.eq.s32.totalorder %s56_s16, 0 }
  0x27   : > { %s147_s28 = sshll.u32 %s139_s27, 4  ;;  %s660_s3 = scalar_lea.hbm %s767_s1, %s338_s15  ;;  %s662_s28 = int_to_ptr.vmem [resolvable:$true] %s147_s28 }
  0x28   : > { %s667_s4 = scalar_select %p59_p7, %s532_s11, %s61_s17  }
  0x29   : > { %s669_s5 = scalar_lea.sflag [#allocation3], %s135_s23  ;;  %s428_s6 = scalar_lea.hbm %s660_s3, 96 }
  0x2a   : > { %p429_p12 = scmp.ne.s32.totalorder %s660_s3, %s428_s6  ;;  %p430_p2 = pneg %p633_p0 }
  0x2b   : > { %s433_s8 = scalar_lea.hbm %s767_s1, 192  ;;  %p434_p10 = scmp.lt.u32.totalorder %s660_s3, %s767_s1 }
  0x2c   : > { %p431_p4 = pnand %p430_p2, %p429_p12  ;;  %p435_p11 = scmp.lt.u32.totalorder %s433_s8, %s428_s6 }
  0x2d   : > { %p437_p1 = scmp.lt.u32.totalorder %s428_s6, %s660_s3 }
  0x2e   : > { %p432_p6 = pneg %p431_p4  ;;  %p436_p5 = por %p435_p11, %p434_p10 }
  0x30   : > { %p438_p7 = por %p437_p1, %p436_p5 }
  0x32   : > { %p439_p9 = pnand %p438_p7, %p432_p6 }
  0x34   : > { %442 = shalt.err (!%p439_p9)
}
  0x35   : > { %s443_s17 = scalar_lea.vmem %s662_s28, 96  ;;  %s547_s23 = smov [#allocation6]  }
  0x36   : > { %p444_p12 = scmp.ne.s32.totalorder %s662_s28, %s443_s17  ;;  %s448_s27 = sshll.u32 %s547_s23, 4  ;;  %s449_s27 = int_to_ptr.vmem [resolvable:$false] %s448_s27 }
  0x37   : > { %s450_s29 = scalar_lea.vmem %s449_s27, 192  ;;  %p451_p3 = scmp.lt.s32.totalorder %s662_s28, %s449_s27 }
  0x38   : > { %p446_p4 = pnand %p444_p12, %p430_p2  ;;  %p452_p10 = scmp.lt.s32.totalorder %s450_s29, %s443_s17 }
  0x3a   : > { %p447_p8 = pneg %p446_p4  ;;  %p453_p11 = por %p452_p10, %p451_p3 }
  0x3c   : > { %p454_p5 = pnand %p453_p11, %p447_p8 }
  0x3e   : > { %457 = shalt.err (!%p454_p5)
}
  0x3f   : > { %s548_s30 = smov 32   ;;  %s549_s6 = smov 2  }
  0x40   : > { %355 = dma.hbm_to_vmem [thread:$0]  (!%p633_p0), %s660_s3, 96, %s662_s28, %s669_s5, %s548_s30, %s548_s30, %s549_s6  }
  0x41   : > { %159 = sbr.rel (%p625_p13) target bundleno = 109 (0x6d), region = 28  ;;  %p779_p9 = scmp.ne.s32.totalorder (!%p625_p13), %s773_s18, 0 }
  0x48   : > { %511 = dma.done.wait (%p779_p9), [#allocation5], 16  }
  0x49   : > { %513 = vsyncadd (%p779_p9), [#allocation5], 4294967280  ;;  %s704_s26 = sand.u32 1, %s528_s10   ;;  %p780_p3 = scmp.ne.s32.totalorder %s774_s19, 0 }
  0x4a   : > { %s339_s7 = smul.u32 6, %s704_s26  ;;  %s166_s8 = scalar_lea.sflag [#allocation3], %s704_s26 }
  0x4c   : > { %s169_s15 = scalar_lea.vmem [#allocation6], %s339_s7 }
  0x4d   : > { %515 = dma.done.wait (%p780_p3), %s166_s8, 96  }
  0x4e   : > { %517 = vsyncadd (%p780_p3), %s166_s8, 4294967200 }
  0x4f   : > { %174 = sfence }
  0x50   : > { %s191_s22 = sld [smem:[#allocation2]]  ;;  %s328_s24 = sld [smem:[#allocation2 + $0x1]]  ;;  %v195_v0 = vld [vmem:[%s169_s15] sm:$0x3]  ;;  %v331_v1 = vld [vmem:[%s169_s15 + $0x2] sm:$0x3] }
  0x51   : > { %s329_s18 = sld [smem:[#allocation2 + $0x2]]  ;;  %s330_s28 = sld [smem:[#allocation2 + $0x3]]  ;;  %v332_v3 = vld [vmem:[%s169_s15 + $0x4] sm:$0x3] }
  0x52   : > { %s327_s3 = sshll.u32 %s704_s26, 1  ;;  %s334_s16 = sshll.u32 %s536_s12, 5 }
  0x53   : > { %s190_s19 = scalar_lea.vmem [#allocation7], %s327_s3  ;;  %s719_s27 = scalar_lea.hbm %s768_s2, %s334_s16 }
  0x54   : > { %s226_s5 = sshll.u32 %s190_s19, 4  ;;  %s212_s29 = scalar_lea.sflag [#allocation4], %s704_s26  ;;  %s714_s5 = int_to_ptr.vmem [resolvable:$true] %s226_s5 }
  0x55   : > { %s458_s30 = scalar_lea.vmem %s714_s5, 32  ;;  %p781_p13 = scmp.ne.s32.totalorder %s775_s20, 0 }
  0x56   : > { %v196_v2 = vstv %s191_s22  ;;  %v200_v5 = vstv %s328_s24  ;;  %p459_p8 = scmp.ne.s32.totalorder %s714_s5, %s458_s30  ;;  %s550_s12 = smov [#allocation7]  }
  0x57   : > { %v197_v4 = vmul.f32 %v196_v2, %v195_v0  ;;  %v201_v6 = vmul.f32 %v331_v1, %v200_v5  ;;  %v205_v7 = vstv %s329_s18  ;;  %v208_v10 = vstv %s330_s28  ;;  %s462_s6 = sshll.u32 %s550_s12, 4  ;;  %s463_s6 = int_to_ptr.vmem [resolvable:$false] %s462_s6 }
  0x58   : > { %v206_v8 = vmul.f32 %v332_v3, %v205_v7  ;;  %p460_p0 = pnand %p459_p8, %p781_p13  ;;  %s464_s7 = scalar_lea.vmem %s463_s6, 64 }
  0x59   : > { %v202_v9 = vadd.f32 %v201_v6, %v197_v4  ;;  %p465_p6 = scmp.lt.s32.totalorder %s714_s5, %s463_s6  ;;  %p466_p1 = scmp.lt.s32.totalorder %s464_s7, %s458_s30 }
  0x5a   : > { %p461_p2 = pneg %p460_p0 }
  0x5b   : > { %v207_v11 = vadd.f32 %v206_v8, %v202_v9  ;;  %p467_p7 = por %p466_p1, %p465_p6 }
  0x5d   : > { %v209_v12 = vadd.f32 %v208_v10, %v207_v11  ;;  %p468_p12 = pnand %p467_p7, %p461_p2 }
  0x5f   : > { %210 = vst [vmem:[%s190_s19] sm:$0x3] %v209_v12 }
  0x60   : > { %471 = shalt.err (!%p468_p12)
}
  0x61   : > { %s472_s26 = scalar_lea.hbm %s719_s27, 32  ;;  %s476_s22 = scalar_lea.hbm %s768_s2, 64 }
  0x62   : > { %p473_p4 = scmp.ne.s32.totalorder %s719_s27, %s472_s26  ;;  %p477_p5 = scmp.lt.u32.totalorder %s719_s27, %s768_s2 }
  0x63   : > { %p478_p9 = scmp.lt.u32.totalorder %s476_s22, %s472_s26  ;;  %p480_p8 = scmp.lt.u32.totalorder %s472_s26, %s719_s27 }
  0x64   : > { %p474_p10 = pnand %p473_p4, %p781_p13 }
  0x65   : > { %p479_p3 = por %p478_p9, %p477_p5 }
  0x66   : > { %p475_p11 = pneg %p474_p10 }
  0x67   : > { %p481_p0 = por %p480_p8, %p479_p3 }
  0x69   : > { %p482_p2 = pnand %p481_p0, %p475_p11 }
  0x6b   : > { %485 = shalt.err (!%p482_p2)
}
  0x6c   : > { %346 = dma.vmem_to_hbm [thread:$0]  (%p781_p13), %s714_s5, 32, %s719_s27, %s212_s29  }
  0x6d PF: > { %s238_s28 = sand.u32 1, %s524_s9   ;;  %p782_p6 = scmp.ne.s32.totalorder %s776_s21, 0 }
  0x6e   : > { %p783_p1 = scmp.ge.s32.totalorder %s544_s14, 2  ;;  %s239_s3 = scalar_lea.sflag [#allocation4], %s238_s28 }
  0x70   : > { %p357_p7 = pnand %p783_p1, %p782_p6 }
  0x72   : > { %519 = dma.done.wait (!%p357_p7), %s239_s3, 32  }
  0x73   : > { %521 = vsyncadd (!%p357_p7), %s239_s3, 4294967264  ;;  %s19_s14 = sadd.s32 1, %s544_s14   ;;  %s784_s9 = smov %s528_s10 }
  0x74   : > { %p16_p12 = scmp.ge.s32.totalorder %s19_s14, 4   ;;  %s785_s10 = smov %s532_s11 }
  0x75   : > { %s786_s11 = smov %s667_s4  ;;  %s787_s12 = smov %s540_s13 }
  0x76   : > { %s788_s13 = smov %s790_s25  ;;  %18 = sbr.rel (!%p16_p12) target bundleno = 7 (0x7), region = 80 }
  0x7d   :  { %244 = vsyncpa [#allocation3], 1 }
  0x7e   :  { %246 = vsyncpa [#allocation3 + $0x1], 1 }
  0x7f   :  { %247 = vsyncpa [#allocation4], 1 }
  0x80   :  { %249 = vsyncpa [#allocation4 + $0x1], 1 }
  0x81   :  { %250 = vsyncpa [#allocation5], 1 }
  0x82   :  { %252 = vsyncpa [#allocation5 + $0x1], 1 }

</bundles_post_ra>
